<compile_context>
chip_gen: v5e
topology: v5e:2x2
jax: 0.10.0
libtpu: 0.0.40
codegen_flags: <defaults>
</compile_context>

<pallas_src>
import functools

import jax
import jax.numpy as jnp
from jax import lax
from jax.experimental import pallas as pl
from jax.experimental.pallas import tpu as pltpu


def _global_context_kernel(x_ref, wkt_ref, bk_ref, w1t_ref, b1_ref, w2_ref,
                           b2_ref, o_ref, m_sc, l_sc, acc_sc,
                           *, hw, tile_hw, neg_slope, needs_mask):
    t = pl.program_id(1)
    last = pl.num_programs(1) - 1

    @pl.when(t == 0)
    def _init():
        m_sc[...] = jnp.full_like(m_sc, -jnp.inf)
        l_sc[...] = jnp.zeros_like(l_sc)
        acc_sc[...] = jnp.zeros_like(acc_sc)

    x = x_ref[...].astype(jnp.float32)     # (C, T)
    wkt = wkt_ref[...]                     # (1, C)  f32
    bk = bk_ref[...]                       # (1, 1)  f32

    def _update(valid):
        # 1x1 conv to one channel: (1,C)@(C,T) on the MXU (contract channels).
        logits = lax.dot_general(wkt, x, (((1,), (0,)), ((), ())),
                                 preferred_element_type=jnp.float32) + bk   # (1, T)
        if valid is not None:
            logits = jnp.where(valid, logits, -jnp.inf)

        # Online softmax over the spatial (lane) axis.
        m_prev = m_sc[...]                                                  # (1, 1)
        m_new = jnp.maximum(m_prev, jnp.max(logits, axis=1, keepdims=True))
        alpha = jnp.exp(m_prev - m_new)
        p = jnp.exp(logits - m_new)            # exactly 0 in masked lanes
        l_sc[...] = alpha * l_sc[...] + jnp.sum(p, axis=1, keepdims=True)

        # Guard stale/NaN data in padded lanes of the final partial tile
        # (p is already 0 there, but 0 * NaN would poison the MXU sum).
        xs = x if valid is None else jnp.where(valid, x, 0.0)
        # Attn-weighted sum of x over lanes on the MXU: (C,T)x(1,T)^T -> (C,1).
        acc_sc[...] = alpha * acc_sc[...] + lax.dot_general(
            xs, p, (((1,), (1,)), ((), ())), preferred_element_type=jnp.float32)
        m_sc[...] = m_new

    if not needs_mask:
        _update(None)                          # every tile is full: no masking at all
    else:
        @pl.when(t != last)
        def _full_tile():
            _update(None)

        @pl.when(t == last)
        def _partial_tile():
            lane = lax.broadcasted_iota(jnp.int32, (1, tile_hw), 1)
            _update((t * tile_hw + lane) < hw)

    @pl.when(t == last)
    def _finalize():
        ctx = acc_sc[...] / l_sc[...]                                       # (C, 1)
        # net[0]: 1x1 conv C -> Ci (w1t is (C, Ci)); reduce over sublanes.
        h = jnp.sum(w1t_ref[...] * ctx, axis=0, keepdims=True) + b1_ref[...]  # (1, Ci)
        h = jnp.where(h > 0, h, neg_slope * h)                              # LeakyReLU(0.1)
        # net[2]: 1x1 conv Ci -> Cout (w2 is (Cout, Ci)); reduce over lanes.
        y = jnp.sum(w2_ref[...] * h, axis=1, keepdims=True) + b2_ref[...]   # (Cout, 1)
        y = 1.0 / (1.0 + jnp.exp(-y))                                       # Sigmoid
        o_ref[...] = y.astype(o_ref.dtype)


def _pick_tile_hw(hw, c_pad, dtype_bytes, target_block_bytes):
    """Largest lane-aligned tile under the byte target; prefer a divisor of HW
    so no tile is partial and masking compiles out entirely."""
    LANE = 128
    target = max(LANE, (target_block_bytes // (c_pad * dtype_bytes)) // LANE * LANE)
    if hw <= target:
        return hw
    if hw % LANE == 0:
        for cand in range(target, LANE - 1, -LANE):
            if hw % cand == 0:
                return cand
    return target   # fall back: cdiv tiling + mask only on the last tile


def global_context(x, to_k_w, to_k_b, net0_w, net0_b, net2_w, net2_b,
                   *, neg_slope=0.1, target_block_bytes=8 << 20,
                   stream_dtype=None):
    """x: (B, C, H, W) NCHW.  Params in PyTorch conv shapes:
       to_k_w (1, C, 1, 1), to_k_b (1,), net0_w (Ci, C, 1, 1), net0_b (Ci,),
       net2_w (Cout, Ci, 1, 1), net2_b (Cout,).
       stream_dtype=jnp.bfloat16 halves HBM traffic (accumulation stays f32)."""
    B, C, H, W = x.shape
    HW = H * W
    Ci = net0_w.shape[0]
    Cout = net2_w.shape[0]

    if stream_dtype is not None:
        x = x.astype(stream_dtype)
    x2 = x.reshape(B, C, HW)

    f32 = jnp.float32
    wkt = to_k_w.reshape(1, C).astype(f32)            # (1, C)
    bk = to_k_b.reshape(1, 1).astype(f32)             # (1, 1)
    w1t = net0_w.reshape(Ci, C).T.astype(f32)         # (C, Ci)
    b1 = net0_b.reshape(1, Ci).astype(f32)            # (1, Ci)
    w2 = net2_w.reshape(Cout, Ci).astype(f32)         # (Cout, Ci)
    b2 = net2_b.reshape(Cout, 1).astype(f32)          # (Cout, 1)

    dtype_bytes = jnp.dtype(x2.dtype).itemsize
    sublane = 8 * max(1, 4 // dtype_bytes)            # 8 f32 / 16 bf16 / 32 int8
    c_pad = -(-C // sublane) * sublane                # VMEM-padded sublane rows

    tile_hw = _pick_tile_hw(HW, c_pad, dtype_bytes, target_block_bytes)
    n_tiles = pl.cdiv(HW, tile_hw)
    needs_mask = (HW % tile_hw) != 0

    # VMEM budget from actual usage: double-buffered x block + params/scratch/
    # output headroom.  Stays well under v7x's 64 MiB physical VMEM.
    block_bytes = c_pad * tile_hw * dtype_bytes
    vmem_limit = min(64 << 20, max(16 << 20, 2 * block_bytes + (4 << 20)))

    flops = 4 * B * C * HW + 6 * B * HW + 2 * B * (C * Ci + Ci * Cout)
    cost = pl.CostEstimate(
        flops=int(flops),
        transcendentals=int(B * (HW + n_tiles + Cout)),
        bytes_accessed=int(B * C * HW * dtype_bytes + B * Cout * dtype_bytes),
    )

    kernel = functools.partial(
        _global_context_kernel, hw=HW, tile_hw=tile_hw, neg_slope=neg_slope,
        needs_mask=needs_mask)

    # TODO(synk): for B == 1 on v7x (2 TensorCores) the batch-parallel axis
    # leaves one core idle; a split-HW two-stage reduction would recover ~2x.
    out = pl.pallas_call(
        kernel,
        out_shape=jax.ShapeDtypeStruct((B, Cout, 1), x.dtype),
        grid_spec=pltpu.PrefetchScalarGridSpec(
            num_scalar_prefetch=0,
            grid=(B, n_tiles),
            in_specs=[
                pl.BlockSpec((None, C, tile_hw), lambda b, t: (b, 0, t)),
                pl.BlockSpec((1, C), lambda b, t: (0, 0)),
                pl.BlockSpec((1, 1), lambda b, t: (0, 0)),
                pl.BlockSpec((C, Ci), lambda b, t: (0, 0)),
                pl.BlockSpec((1, Ci), lambda b, t: (0, 0)),
                pl.BlockSpec((Cout, Ci), lambda b, t: (0, 0)),
                pl.BlockSpec((Cout, 1), lambda b, t: (0, 0)),
            ],
            out_specs=pl.BlockSpec((None, Cout, 1), lambda b, t: (b, 0, 0)),
            scratch_shapes=[
                pltpu.VMEM((1, 1), jnp.float32),   # running max
                pltpu.VMEM((1, 1), jnp.float32),   # running softmax denominator
                pltpu.VMEM((C, 1), jnp.float32),   # running attn-weighted sum of x
            ],
        ),
        compiler_params=pltpu.CompilerParams(
            dimension_semantics=("parallel", "arbitrary"),
            vmem_limit_bytes=int(vmem_limit),
        ),
        cost_estimate=cost,
    )(x2, wkt, bk, w1t, b1, w2, b2)

    return out.reshape(B, Cout, 1, 1)


def _reference(x, to_k_w, to_k_b, net0_w, net0_b, net2_w, net2_b, neg_slope=0.1):
    """Plain-JAX reference matching the PyTorch forward."""
    B, C, H, W = x.shape
    HW = H * W
    Ci = net0_w.shape[0]
    Cout = net2_w.shape[0]
    xf = x.reshape(B, C, HW)
    logits = jnp.einsum('c,bcn->bn', to_k_w.reshape(C), xf) + to_k_b.reshape(())
    attn = jax.nn.softmax(logits, axis=-1)
    ctx = jnp.einsum('bn,bcn->bc', attn, xf)
    h = ctx @ net0_w.reshape(Ci, C).T + net0_b.reshape(Ci)
    h = jnp.where(h > 0, h, neg_slope * h)
    y = jax.nn.sigmoid(h @ net2_w.reshape(Cout, Ci).T + net2_b.reshape(Cout))
    return y.reshape(B, Cout, 1, 1)


if __name__ == "__main__":
    key = jax.random.PRNGKey(0)
    B, C, H, W = 2, 4, 16, 16
    chan_out = 6
    Ci = max(3, chan_out // 2)

    ks = jax.random.split(key, 7)
    x = jax.random.normal(ks[0], (B, C, H, W), dtype=jnp.float32)
    to_k_w = jax.random.normal(ks[1], (1, C, 1, 1), dtype=jnp.float32) * 0.5
    to_k_b = jax.random.normal(ks[2], (1,), dtype=jnp.float32) * 0.1
    net0_w = jax.random.normal(ks[3], (Ci, C, 1, 1), dtype=jnp.float32) * 0.5
    net0_b = jax.random.normal(ks[4], (Ci,), dtype=jnp.float32) * 0.1
    net2_w = jax.random.normal(ks[5], (chan_out, Ci, 1, 1), dtype=jnp.float32) * 0.5
    net2_b = jax.random.normal(ks[6], (chan_out,), dtype=jnp.float32) * 0.1

    # Case 1: HW fits in one full tile -> mask-free fast path.
    y = global_context(x, to_k_w, to_k_b, net0_w, net0_b, net2_w, net2_b)
    jax.block_until_ready(y)
    y_ref = _reference(x, to_k_w, to_k_b, net0_w, net0_b, net2_w, net2_b)
    assert jnp.allclose(y, y_ref, atol=1e-5, rtol=1e-5), "mismatch (full-tile path)"

    # Case 2: odd HW + tiny byte target -> multi-tile online softmax with a
    # masked final partial tile (exercises the cdiv/mask path).
    H2 = W2 = 17
    x_b = jax.random.normal(jax.random.PRNGKey(1), (B, C, H2, W2), dtype=jnp.float32)
    y2 = global_context(x_b, to_k_w, to_k_b, net0_w, net0_b, net2_w, net2_b,
                        target_block_bytes=1)
    jax.block_until_ready(y2)
    y2_ref = _reference(x_b, to_k_w, to_k_b, net0_w, net0_b, net2_w, net2_b)
    assert jnp.allclose(y2, y2_ref, atol=1e-5, rtol=1e-5), "mismatch (masked path)"

    print("KERNEL_OK")
</pallas_src>

<mosaic_0001>
module attributes {stable_mosaic.version = 11 : i64} {
  func.func @_global_context_kernel(%arg0: i32, %arg1: i32, %arg2: memref<1x4x256xf32, #tpu.memory_space<vmem>>, %arg3: memref<1x4xf32, #tpu.memory_space<vmem>>, %arg4: memref<1x1xf32, #tpu.memory_space<vmem>>, %arg5: memref<4x3xf32, #tpu.memory_space<vmem>>, %arg6: memref<1x3xf32, #tpu.memory_space<vmem>>, %arg7: memref<6x3xf32, #tpu.memory_space<vmem>>, %arg8: memref<6x1xf32, #tpu.memory_space<vmem>>, %arg9: memref<1x6x1xf32, #tpu.memory_space<vmem>>, %arg10: memref<1x1xf32, #tpu.memory_space<vmem>>, %arg11: memref<1x1xf32, #tpu.memory_space<vmem>>, %arg12: memref<4x1xf32, #tpu.memory_space<vmem>>) attributes {dimension_semantics = [#tpu.dimension_semantics<parallel>, #tpu.dimension_semantics<arbitrary>], iteration_bounds = array<i64: 2, 1>, scalar_prefetch = 0 : i64, scratch_operands = 3 : i64, tpu.core_type = #tpu.core_type<tc>, window_params = [{transform_indices = @transform_0, window_bounds = array<i64: 1, 4, 256>}, {pipeline_mode = #tpu.pipeline_mode<synchronous>, transform_indices = @transform_1, window_bounds = array<i64: 1, 4>}, {pipeline_mode = #tpu.pipeline_mode<synchronous>, transform_indices = @transform_2, window_bounds = array<i64: 1, 1>}, {pipeline_mode = #tpu.pipeline_mode<synchronous>, transform_indices = @transform_3, window_bounds = array<i64: 4, 3>}, {pipeline_mode = #tpu.pipeline_mode<synchronous>, transform_indices = @transform_4, window_bounds = array<i64: 1, 3>}, {pipeline_mode = #tpu.pipeline_mode<synchronous>, transform_indices = @transform_5, window_bounds = array<i64: 6, 3>}, {pipeline_mode = #tpu.pipeline_mode<synchronous>, transform_indices = @transform_6, window_bounds = array<i64: 6, 1>}, {transform_indices = @transform_7, window_bounds = array<i64: 1, 6, 1>}]} {
    %c0_i32 = arith.constant 0 : i32
    %0 = arith.cmpi eq, %arg1, %c0_i32 : i32
    %1 = arith.extui %0 : i1 to i32
    %c0_i32_0 = arith.constant 0 : i32
    %2 = arith.cmpi ne, %1, %c0_i32_0 : i32
    scf.if %2 {
      %cst_24 = arith.constant 0xFF800000 : f32
      %35 = vector.broadcast %cst_24 : f32 to vector<1x1xf32>
      %c0_25 = arith.constant 0 : index
      %c0_26 = arith.constant 0 : index
      %36 = vector.load %arg10[%c0_25, %c0_26] : memref<1x1xf32, #tpu.memory_space<vmem>>, vector<1x1xf32>
      tpu.vector_store %arg10[%c0_25, %c0_26], %35 {strides = array<i32>} : memref<1x1xf32, #tpu.memory_space<vmem>>, vector<1x1xf32>,
      %cst_27 = arith.constant 0.000000e+00 : f32
      %37 = vector.broadcast %cst_27 : f32 to vector<1x1xf32>
      %c0_28 = arith.constant 0 : index
      %c0_29 = arith.constant 0 : index
      %38 = vector.load %arg11[%c0_28, %c0_29] : memref<1x1xf32, #tpu.memory_space<vmem>>, vector<1x1xf32>
      tpu.vector_store %arg11[%c0_28, %c0_29], %37 {strides = array<i32>} : memref<1x1xf32, #tpu.memory_space<vmem>>, vector<1x1xf32>,
      %cst_30 = arith.constant 0.000000e+00 : f32
      %39 = vector.broadcast %cst_30 : f32 to vector<4x1xf32>
      %c0_31 = arith.constant 0 : index
      %c0_32 = arith.constant 0 : index
      %40 = vector.load %arg12[%c0_31, %c0_32] : memref<4x1xf32, #tpu.memory_space<vmem>>, vector<4x1xf32>
      tpu.vector_store %arg12[%c0_31, %c0_32], %39 {strides = array<i32>} : memref<4x1xf32, #tpu.memory_space<vmem>>, vector<4x1xf32>,
    } else {
    }
    %c0 = arith.constant 0 : index
    %c0_1 = arith.constant 0 : index
    %c0_2 = arith.constant 0 : index
    %3 = vector.load %arg2[%c0, %c0_1, %c0_2] : memref<1x4x256xf32, #tpu.memory_space<vmem>>, vector<1x4x256xf32>
    %4 = vector.shape_cast %3 : vector<1x4x256xf32> to vector<4x256xf32>
    %c0_3 = arith.constant 0 : index
    %c0_4 = arith.constant 0 : index
    %5 = vector.load %arg3[%c0_3, %c0_4] : memref<1x4xf32, #tpu.memory_space<vmem>>, vector<1x4xf32>
    %c0_5 = arith.constant 0 : index
    %c0_6 = arith.constant 0 : index
    %6 = vector.load %arg4[%c0_5, %c0_6] : memref<1x1xf32, #tpu.memory_space<vmem>>, vector<1x1xf32>
    %cst = arith.constant dense<0.000000e+00> : vector<1x256xf32>
    %7 = tpu.matmul %5, %4, %cst {dimension_numbers = #tpu.dot_dimension_numbers<[1], [0], [0], [1], [0, 0, 1, 1], [], []>} : vector<1x4xf32>, vector<4x256xf32>, vector<1x256xf32> -> vector<1x256xf32>
    %8 = vector.broadcast %6 : vector<1x1xf32> to vector<1x256xf32>
    %9 = arith.addf %7, %8 : vector<1x256xf32>
    %c0_7 = arith.constant 0 : index
    %c0_8 = arith.constant 0 : index
    %10 = vector.load %arg10[%c0_7, %c0_8] : memref<1x1xf32, #tpu.memory_space<vmem>>, vector<1x1xf32>
    %cst_9 = arith.constant dense<0xFF800000> : vector<1xf32>
    %11 = vector.multi_reduction <maximumf>, %9, %cst_9 [1] : vector<1x256xf32> to vector<1xf32>
    %12 = vector.shape_cast %11 : vector<1xf32> to vector<1x1xf32>
    %13 = arith.maximumf %10, %12 : vector<1x1xf32>
    %14 = arith.subf %10, %13 : vector<1x1xf32>
    %15 = math.exp %14 : vector<1x1xf32>
    %16 = vector.broadcast %13 : vector<1x1xf32> to vector<1x256xf32>
    %17 = arith.subf %9, %16 : vector<1x256xf32>
    %18 = math.exp %17 : vector<1x256xf32>
    %c0_10 = arith.constant 0 : index
    %c0_11 = arith.constant 0 : index
    %19 = vector.load %arg11[%c0_10, %c0_11] : memref<1x1xf32, #tpu.memory_space<vmem>>, vector<1x1xf32>
    %20 = arith.mulf %15, %19 : vector<1x1xf32>
    %cst_12 = arith.constant dense<0.000000e+00> : vector<1xf32>
    %21 = vector.multi_reduction <add>, %18, %cst_12 [1] : vector<1x256xf32> to vector<1xf32>
    %22 = vector.shape_cast %21 : vector<1xf32> to vector<1x1xf32>
    %23 = arith.addf %20, %22 : vector<1x1xf32>
    %c0_13 = arith.constant 0 : index
    %c0_14 = arith.constant 0 : index
    %24 = vector.load %arg11[%c0_13, %c0_14] : memref<1x1xf32, #tpu.memory_space<vmem>>, vector<1x1xf32>
    tpu.vector_store %arg11[%c0_13, %c0_14], %23 {strides = array<i32>} : memref<1x1xf32, #tpu.memory_space<vmem>>, vector<1x1xf32>,
    %c0_15 = arith.constant 0 : index
    %c0_16 = arith.constant 0 : index
    %25 = vector.load %arg12[%c0_15, %c0_16] : memref<4x1xf32, #tpu.memory_space<vmem>>, vector<4x1xf32>
    %26 = vector.broadcast %15 : vector<1x1xf32> to vector<4x1xf32>
    %27 = arith.mulf %26, %25 : vector<4x1xf32>
    %cst_17 = arith.constant dense<0.000000e+00> : vector<4x1xf32>
    %28 = tpu.matmul %4, %18, %cst_17 {dimension_numbers = #tpu.dot_dimension_numbers<[1], [1], [0], [0], [0, 0, 1, 0], [], []>} : vector<4x256xf32>, vector<1x256xf32>, vector<4x1xf32> -> vector<4x1xf32>
    %29 = arith.addf %27, %28 : vector<4x1xf32>
    %c0_18 = arith.constant 0 : index
    %c0_19 = arith.constant 0 : index
    %30 = vector.load %arg12[%c0_18, %c0_19] : memref<4x1xf32, #tpu.memory_space<vmem>>, vector<4x1xf32>
    tpu.vector_store %arg12[%c0_18, %c0_19], %29 {strides = array<i32>} : memref<4x1xf32, #tpu.memory_space<vmem>>, vector<4x1xf32>,
    %c0_20 = arith.constant 0 : index
    %c0_21 = arith.constant 0 : index
    %31 = vector.load %arg10[%c0_20, %c0_21] : memref<1x1xf32, #tpu.memory_space<vmem>>, vector<1x1xf32>
    tpu.vector_store %arg10[%c0_20, %c0_21], %13 {strides = array<i32>} : memref<1x1xf32, #tpu.memory_space<vmem>>, vector<1x1xf32>,
    %c0_i32_22 = arith.constant 0 : i32
    %32 = arith.cmpi eq, %arg1, %c0_i32_22 : i32
    %33 = arith.extui %32 : i1 to i32
    %c0_i32_23 = arith.constant 0 : i32
    %34 = arith.cmpi ne, %33, %c0_i32_23 : i32
    scf.if %34 {
      %c0_24 = arith.constant 0 : index
      %c0_25 = arith.constant 0 : index
      %35 = vector.load %arg12[%c0_24, %c0_25] : memref<4x1xf32, #tpu.memory_space<vmem>>, vector<4x1xf32>
      %c0_26 = arith.constant 0 : index
      %c0_27 = arith.constant 0 : index
      %36 = vector.load %arg11[%c0_26, %c0_27] : memref<1x1xf32, #tpu.memory_space<vmem>>, vector<1x1xf32>
      %37 = vector.broadcast %36 : vector<1x1xf32> to vector<4x1xf32>
      %38 = arith.divf %35, %37 : vector<4x1xf32>
      %c0_28 = arith.constant 0 : index
      %c0_29 = arith.constant 0 : index
      %39 = vector.load %arg5[%c0_28, %c0_29] : memref<4x3xf32, #tpu.memory_space<vmem>>, vector<4x3xf32>
      %40 = vector.broadcast %38 : vector<4x1xf32> to vector<4x3xf32>
      %41 = arith.mulf %39, %40 : vector<4x3xf32>
      %cst_30 = arith.constant dense<0.000000e+00> : vector<3xf32>
      %42 = vector.multi_reduction <add>, %41, %cst_30 [0] : vector<4x3xf32> to vector<3xf32>
      %43 = vector.shape_cast %42 : vector<3xf32> to vector<1x3xf32>
      %c0_31 = arith.constant 0 : index
      %c0_32 = arith.constant 0 : index
      %44 = vector.load %arg6[%c0_31, %c0_32] : memref<1x3xf32, #tpu.memory_space<vmem>>, vector<1x3xf32>
      %45 = arith.addf %43, %44 : vector<1x3xf32>
      %cst_33 = arith.constant 0.000000e+00 : f32
      %46 = vector.broadcast %cst_33 : f32 to vector<1x3xf32>
      %47 = arith.cmpf ogt, %45, %46 : vector<1x3xf32>
      %cst_34 = arith.constant 1.000000e-01 : f32
      %48 = vector.broadcast %cst_34 : f32 to vector<1x3xf32>
      %49 = arith.mulf %48, %45 : vector<1x3xf32>
      %50 = arith.select %47, %45, %49 : vector<1x3xi1>, vector<1x3xf32>
      %c0_35 = arith.constant 0 : index
      %c0_36 = arith.constant 0 : index
      %51 = vector.load %arg7[%c0_35, %c0_36] : memref<6x3xf32, #tpu.memory_space<vmem>>, vector<6x3xf32>
      %52 = vector.broadcast %50 : vector<1x3xf32> to vector<6x3xf32>
      %53 = arith.mulf %51, %52 : vector<6x3xf32>
      %cst_37 = arith.constant dense<0.000000e+00> : vector<6xf32>
      %54 = vector.multi_reduction <add>, %53, %cst_37 [1] : vector<6x3xf32> to vector<6xf32>
      %55 = vector.shape_cast %54 : vector<6xf32> to vector<6x1xf32>
      %c0_38 = arith.constant 0 : index
      %c0_39 = arith.constant 0 : index
      %56 = vector.load %arg8[%c0_38, %c0_39] : memref<6x1xf32, #tpu.memory_space<vmem>>, vector<6x1xf32>
      %57 = arith.addf %55, %56 : vector<6x1xf32>
      %cst_40 = arith.constant 0.000000e+00 : f32
      %58 = vector.broadcast %cst_40 : f32 to vector<6x1xf32>
      %59 = arith.subf %58, %57 : vector<6x1xf32>
      %60 = math.exp %59 : vector<6x1xf32>
      %cst_41 = arith.constant 1.000000e+00 : f32
      %61 = vector.broadcast %cst_41 : f32 to vector<6x1xf32>
      %62 = arith.addf %61, %60 : vector<6x1xf32>
      %cst_42 = arith.constant 1.000000e+00 : f32
      %63 = vector.broadcast %cst_42 : f32 to vector<6x1xf32>
      %64 = arith.divf %63, %62 : vector<6x1xf32>
      %c0_43 = arith.constant 0 : index
      %c0_44 = arith.constant 0 : index
      %c0_45 = arith.constant 0 : index
      %65 = vector.load %arg9[%c0_43, %c0_44, %c0_45] : memref<1x6x1xf32, #tpu.memory_space<vmem>>, vector<1x6x1xf32>
      %66 = vector.shape_cast %65 : vector<1x6x1xf32> to vector<6x1xf32>
      %67 = vector.shape_cast %64 : vector<6x1xf32> to vector<1x6x1xf32>
      tpu.vector_store %arg9[%c0_43, %c0_44, %c0_45], %67 {strides = array<i32>} : memref<1x6x1xf32, #tpu.memory_space<vmem>>, vector<1x6x1xf32>,
    } else {
    }
    return
  }
  func.func @transform_0(%arg0: i32, %arg1: i32) -> (i32, i32, i32) {
    %c0_i32 = arith.constant 0 : i32
    %c0_i32_0 = arith.constant 0 : i32
    return %arg0, %c0_i32, %arg1 : i32, i32, i32
  }
  func.func @transform_1(%arg0: i32, %arg1: i32) -> (i32, i32) {
    %c0_i32 = arith.constant 0 : i32
    %c0_i32_0 = arith.constant 0 : i32
    %c0_i32_1 = arith.constant 0 : i32
    return %c0_i32, %c0_i32_0 : i32, i32
  }
  func.func @transform_2(%arg0: i32, %arg1: i32) -> (i32, i32) {
    %c0_i32 = arith.constant 0 : i32
    %c0_i32_0 = arith.constant 0 : i32
    %c0_i32_1 = arith.constant 0 : i32
    return %c0_i32, %c0_i32_0 : i32, i32
  }
  func.func @transform_3(%arg0: i32, %arg1: i32) -> (i32, i32) {
    %c0_i32 = arith.constant 0 : i32
    %c0_i32_0 = arith.constant 0 : i32
    %c0_i32_1 = arith.constant 0 : i32
    return %c0_i32, %c0_i32_0 : i32, i32
  }
  func.func @transform_4(%arg0: i32, %arg1: i32) -> (i32, i32) {
    %c0_i32 = arith.constant 0 : i32
    %c0_i32_0 = arith.constant 0 : i32
    %c0_i32_1 = arith.constant 0 : i32
    return %c0_i32, %c0_i32_0 : i32, i32
  }
  func.func @transform_5(%arg0: i32, %arg1: i32) -> (i32, i32) {
    %c0_i32 = arith.constant 0 : i32
    %c0_i32_0 = arith.constant 0 : i32
    %c0_i32_1 = arith.constant 0 : i32
    return %c0_i32, %c0_i32_0 : i32, i32
  }
  func.func @transform_6(%arg0: i32, %arg1: i32) -> (i32, i32) {
    %c0_i32 = arith.constant 0 : i32
    %c0_i32_0 = arith.constant 0 : i32
    %c0_i32_1 = arith.constant 0 : i32
    return %c0_i32, %c0_i32_0 : i32, i32
  }
  func.func @transform_7(%arg0: i32, %arg1: i32) -> (i32, i32, i32) {
    %c0_i32 = arith.constant 0 : i32
    %c0_i32_0 = arith.constant 0 : i32
    %c0_i32_1 = arith.constant 0 : i32
    return %arg0, %c0_i32, %c0_i32_0 : i32, i32, i32
  }
}

</mosaic_0001>

<bundles_post_ra>
// kernel: tpu_custom_call.1
= control target key start
LH: loop header
LB: loop body
LE: loop exit
PB: predicated region body
PF: predicated region fallthrough
CT: control target
= control target key end

     0   :  { %s707_s26 = smov 0   ;;  %s709_s27 = smov 0   ;;  %s777_s0 = inlined_call_operand.vmem [shape: f32[2,4,256], index: 0, kind: input, shape index: {}]   ;;  %s778_s1 = inlined_call_operand.vmem [shape: f32[1,4], index: 1, kind: input, shape index: {}]   ;;  %s779_s2 = inlined_call_operand.<no memory space> [shape: f32[1,1], index: 2, kind: input, shape index: {}]   ;;  %s780_s3 = inlined_call_operand.vmem [shape: f32[4,3], index: 3, kind: input, shape index: {}]   ;;  %s781_s4 = inlined_call_operand.vmem [shape: f32[1,3], index: 4, kind: input, shape index: {}]   ;;  %s782_s5 = inlined_call_operand.vmem [shape: f32[6,3], index: 5, kind: input, shape index: {}]   ;;  %s783_s6 = inlined_call_operand.vmem [shape: f32[6,1], index: 6, kind: input, shape index: {}]   ;;  %s784_s7 = inlined_call_operand.vmem [shape: f32[2,6,1], index: 7, kind: output, shape index: {}]  }
   0x1   :  { %v12_v0 = vstv %s779_s2  ;;  %s711_s28 = smov 0  }
   0x2   :  { %13 = vst [vmem:[#allocation5] sm:$0x1] %v12_v0 }
   0x3 LB: > { %s31_s2 = sadd.s32 1, %s655_s27  ;;  %p583_p0 = scmp.ge.s32.totalorder %s659_s28, 1  ;;  %s659_s28 = sphi %s711_s28, %s19_s28   ;;  %s655_s27 = sphi %s709_s27, %s786_s27   ;;  %s651_s26 = sphi %s707_s26, %s785_s26  }
   0x4   : > { %p33_p1 = scmp.ge.s32.totalorder %s31_s2, 2  ;;  %p258_p2 = scmp.lt.s32.totalorder %s659_s28, 3 }
   0x6   : > { %s788_s2 = smov (%p33_p1, %s31_s2), 0  ;;  %p259_p3 = pnand %p583_p0, %p258_p2 }
   0x7   : > { %p294_p4 = scmp.lt.s32.totalorder (!%p259_p3), %s651_s26, 1 }
   0x8   : > { %262 = sbr.rel (%p259_p3) target bundleno = 817 (0x331), region = 48 }
   0xd   : > { %v661_v1 = vmov 0   ;;  %v318_v2 = vld [vmem:[#allocation5] sm:$0x1]  ;;  %s790_s26 = smov (!%p294_p4, %s651_s26), 1  ;;  %vm333_vm0 = vcmask 1043456   ;;  %vm329_vm1 = vcmask 31744  }
   0xe   : > { %621 = vset.pattern.permute.xlu0 %v661_v1  ;;  %622 = vset.pattern.permute.xlu1 %v661_v1  ;;  %s593_s29 = sshll.u32 %s790_s26, 3  ;;  %v317_v4 = vld [vmem:[%s778_s1] sm:$0x1]  ;;  %vm311_vm2 = vcmask 0   ;;  %v662_v7 = vmov -inf   ;;  %vm379_vm3 = vcmask 1040384  }
   0xf   : > { %321 = vperm.xlu0 %621, %v318_v2   ;;  %623 = vset.pattern.permute.xlu2 %v661_v1  ;;  %s301_s9 = scalar_lea.vmem %s777_s0, %s593_s29  ;;  %312 = vst.msk [vmem:[#allocation2] sm:$0x1] %vm311_vm2, %v662_v7  ;;  %v663_v17 = vmov 0.0   ;;  %vm314_vm4 = vcmask 3072   ;;  %vm469_vm9 = vcmask 19456   ;;  %vm485_vm11 = vcmask 21504   ;;  %s306_s22 = scalar_lea.vmem %s784_s7, %s593_s29 }
  0x10   : > { %v316_v3 = vld [vmem:[%s301_s9] sm:$0xff]  ;;  %313 = vst.msk [vmem:[#allocation3] sm:$0x1] %vm311_vm2, %v663_v17  ;;  %vm510_vm14 = vcmask 5120  }
  0x11   : > { %326 = vst [vmem:[#allocation1] ss:$2 sm:$0xff] %v316_v3 }
  0x12   : > { %315 = vst.msk [vmem:[#allocation4] sm:$0xf] %vm314_vm4, %v663_v17  ;;  %v482_v17 = vld [vmem:[%s782_s5] sm:$0x3f] }
  0x16   : > { %v378_v18 = vld [vmem:[#allocation2] sm:$0x1] }
  0x17   : > { %v401_v45 = vld [vmem:[#allocation3] sm:$0x1] }
  0x18   : > { %v327_v5 = vld.sshfl [vmem:[#allocation1] sm:$0xff pattern:$0x75316420]  ;;  %v328_v6 = vld.sshfl [vmem:[#allocation1 + $0x8] sm:$0xff pattern:$0x75316420] }
  0x19   : > { %587 = vmatpush.msk.msra.mxu0 %vm333_vm0, %v327_v5  ;;  %589 = vmatpush.msk.msra.mxu1 %vm333_vm0, %v328_v6  ;;  %v411_v51 = vld [vmem:[#allocation4] sm:$0xf] }
  0x1a   : > { %588 = vmatmul.msk.f32.vlgmr.msra.gmra.mxu0 %vm329_vm1, %v317_v4  ;;  %590 = vmatmul.msk.f32.vlgmr.msra.gmra.mxu1 %vm329_vm1, %v317_v4 }
  0x81   : > { %v322_v8 = vpop.permute.xlu0 %321 }
  0x82   : > { %v324_v9 = vperm.slane %v322_v8, 0 }
  0x97   : > { %v355_v10 = vpop.f32.mrf.mxu0  ;;  %v375_v11 = vpop.f32.mrf.mxu1 }
  0x98   : > { %v356_v12 = vadd.f32 %v355_v10, %v324_v9  ;;  %v376_v13 = vadd.f32 %v375_v11, %v324_v9 }
  0x9a   : > { %v380_v14 = vsel %vm379_vm3, %v356_v12, -inf  ;;  %v381_v15 = vsel %vm379_vm3, %v376_v13, -inf }
  0x9b   : > { %v382_v16 = vmax.f32 %v380_v14, %v381_v15 }
  0x9d   : > { %383 = vmax.xlane.f32.xlu0 %v382_v16 }
 0x110   : > { %v384_v19 = vpop.xlane.xlu0 %383 }
 0x111   : > { %v385_v20 = vmax.f32 %v378_v18, %v384_v19 }
 0x113   : > { %v386_v21 = vsub.f32 %v378_v18, %v385_v20  ;;  %438 = vst.msk [vmem:[#allocation2] sm:$0x1] %vm311_vm2, %v385_v20  ;;  %391 = vperm.xlu1 %622, %v385_v20  }
 0x115   : > { %v387_v43 = vmul.f32 1.442695, %v386_v21  ;;  %v489_v21 = vld [vmem:[%s783_s6] sm:$0x3f] }
 0x185   : > { %v392_v22 = vpop.permute.xlu1 %391 }
 0x186   : > { %v394_v23 = vperm.slane %v392_v22, 0 }
 0x188   : > { %v395_v24 = vsub.f32 %v356_v12, %v394_v23  ;;  %v396_v25 = vsub.f32 %v376_v13, %v394_v23  ;;  %v477_v12 = vld [vmem:[%s781_s4] sm:$0x1] }
 0x18a   : > { %v397_v26 = vmul.f32 1.442695, %v395_v24  ;;  %v399_v27 = vmul.f32 1.442695, %v396_v25 }
 0x18c   : > { %625 = vpow2.f32 %v397_v26 }
 0x18d   : > { %627 = vpow2.f32 %v399_v27 }
 0x18e   : > { %629 = vpow2.f32 %v387_v43 }
 0x192   : > { %v626_v28 = vpop.eup %625 }
 0x193   : > { %v628_v29 = vpop.eup %627  ;;  %v403_v30 = vsel %vm379_vm3, %v626_v28, 0.0  ;;  %v416_v34 = vperm.slane %v626_v28, 0 }
 0x194   : > { %v417_v31 = vperm.slane %v628_v29, 0  ;;  %v404_v32 = vsel %vm379_vm3, %v628_v29, 0.0  ;;  %v630_v44 = vpop.eup %629 }
 0x195   : > { %v405_v33 = vadd.f32 %v404_v32, %v403_v30  ;;  %v402_v46 = vmul.f32 %v630_v44, %v401_v45  ;;  %v413_v49 = vperm.slane %v630_v44, 0 }
 0x196   : > { %v420_v35 = vrot.slane %v417_v31, 4 }
 0x197   : > { %406 = vadd.xlane.f32.xlu1 %v405_v33  ;;  %v415_v52 = vmul.f32 %v413_v49, %v411_v51 }
 0x198   : > { %v421_v36 = vsel %vm333_vm0, %v416_v34, %v420_v35 }
 0x199   : > { %v423_v37 = vmul.f32 %v421_v36, %v316_v3  ;;  %v462_v3 = vld [vmem:[%s780_s3] sm:$0xf] }
 0x19b   : > { %425 = vst [vmem:[#allocation1] ss:$2 sm:$0xff] %v423_v37 }
 0x1a2   : > { %v426_v38 = vld.sshfl [vmem:[#allocation1] sm:$0xff pattern:$0x75316420]  ;;  %v427_v39 = vld.sshfl [vmem:[#allocation1 + $0x8] sm:$0xff pattern:$0x75316420] }
 0x1a3   : > { %v430_v40 = vsel %vm333_vm0, %v426_v38, 0.0  ;;  %v431_v41 = vsel %vm333_vm0, %v427_v39, 0.0 }
 0x1a4   : > { %v432_v42 = vadd.f32 %v431_v41, %v430_v40 }
 0x1a6   : > { %433 = vadd.xlane.f32.xlu2 %v432_v42 }
 0x20a   : > { %v407_v47 = vpop.xlane.xlu1 %406 }
 0x20b   : > { %v408_v48 = vadd.f32 %v407_v47, %v402_v46 }
 0x20d   : > { %410 = vst.msk [vmem:[#allocation3] sm:$0x1] %vm311_vm2, %v408_v48 }
 0x214   : > { %v624_v50 = vld [vmem:[#allocation3] ss:$0 sm:$0xff] }
 0x215   : > { %631 = vrcp.f32 %v624_v50  ;;  %v458_v58 = vand.u32 2147483648, %v624_v50  ;;  %v456_v60 = vand.u32 2147483647, %v624_v50  ;;  %vm452_vm6 = vweird.f32 %v624_v50 }
 0x217   : > { %v459_v62 = vor.u32 1.1754944e-38, %v458_v58  ;;  %vm457_vm8 = vcmp.eq.f32.partialorder %v456_v60, 8.507059e+37 }
 0x219   : > { %v434_v53 = vpop.xlane.xlu2 %433 }
 0x21a   : > { %v435_v54 = vadd.f32 %v434_v53, %v415_v52 }
 0x21b   : > { %v632_v55 = vpop.eup %631 }
 0x21c   : > { %437 = vst.msk [vmem:[#allocation4] sm:$0xf] %vm314_vm4, %v435_v54  ;;  %v448_v56 = vmul.f32 %v632_v55, %v624_v50  ;;  %vm453_vm5 = vweird.f32 %v632_v55 }
 0x21d   : > { %vm454_vm7 = vmor %vm452_vm6, %vm453_vm5 }
 0x21e   : > { %v449_v57 = vsub.f32 1.0, %v448_v56 }
 0x220   : > { %v450_v59 = vmul.f32 %v632_v55, %v449_v57 }
 0x222   : > { %v451_v61 = vadd.f32 %v632_v55, %v450_v59 }
 0x223   : > { %v442_v0 = vld [vmem:[#allocation4] sm:$0xf] }
 0x224   : > { %v455_v63 = vsel %vm454_vm7, %v632_v55, %v451_v61 }
 0x225   : > { %v460_v1 = vsel %vm457_vm8, %v459_v62, %v455_v63 }
 0x226   : > { %v461_v2 = vmul.f32 %v460_v1, %v442_v0 }
 0x228   : > { %465 = vperm.xlu2 %623, %v461_v2  }
 0x282   : > { %v466_v4 = vpop.permute.xlu2 %465 }
 0x283   : > { %v468_v5 = vmul.f32 %v466_v4, %v462_v3 }
 0x285   : > { %v470_v6 = vsel %vm469_vm9, %v468_v5, 0.0 }
 0x286   : > { %v471_v7 = vrot.slane %v470_v6, 4 }
 0x288   : > { %v472_v8 = vadd.f32 %v471_v7, %v470_v6 }
 0x28a   : > { %v473_v9 = vrot.slane %v472_v8, 2 }
 0x28c   : > { %v474_v10 = vadd.f32 %v473_v9, %v472_v8 }
 0x28e   : > { %v475_v11 = vrot.slane %v474_v10, 1 }
 0x290   : > { %v476_v13 = vadd.f32 %v475_v11, %v474_v10 }
 0x292   : > { %v478_v14 = vadd.f32 %v477_v12, %v476_v13 }
 0x294   : > { %vm479_vm10 = vcmp.gt.f32.partialorder %v478_v14, 0.0  ;;  %v480_v15 = vmul.f32 0.1, %v478_v14 }
 0x296   : > { %v481_v16 = vsel %vm479_vm10, %v478_v14, %v480_v15 }
 0x297   : > { %v483_v18 = vperm.slane %v481_v16, 0 }
 0x299   : > { %v484_v19 = vmul.f32 %v483_v18, %v482_v17 }
 0x29b   : > { %v486_v20 = vsel %vm485_vm11, %v484_v19, 0.0 }
 0x29c   : > { %487 = vadd.xlane.f32.xlu2 %v486_v20 }
 0x30f   : > { %v488_v22 = vpop.xlane.xlu2 %487 }
 0x310   : > { %v490_v23 = vadd.f32 %v489_v21, %v488_v22 }
 0x312   : > { %v491_v24 = vsub.f32 0.0, %v490_v23 }
 0x314   : > { %v492_v25 = vmul.f32 1.442695, %v491_v24 }
 0x316   : > { %633 = vpow2.f32 %v492_v25 }
 0x31c   : > { %v634_v26 = vpop.eup %633 }
 0x31d   : > { %v494_v27 = vadd.f32 1.0, %v634_v26 }
 0x31f   : > { %635 = vrcp.f32 %v494_v27  ;;  %v506_v31 = vand.u32 2147483648, %v494_v27  ;;  %v504_v33 = vand.u32 2147483647, %v494_v27  ;;  %vm500_vm13 = vweird.f32 %v494_v27 }
 0x321   : > { %v507_v35 = vor.u32 1.1754944e-38, %v506_v31  ;;  %vm505_vm0 = vcmp.eq.f32.partialorder %v504_v33, 8.507059e+37 }
 0x325   : > { %v636_v28 = vpop.eup %635 }
 0x326   : > { %v496_v29 = vmul.f32 %v636_v28, %v494_v27  ;;  %vm501_vm12 = vweird.f32 %v636_v28 }
 0x327   : > { %vm502_vm15 = vmor %vm500_vm13, %vm501_vm12 }
 0x328   : > { %v497_v30 = vsub.f32 1.0, %v496_v29 }
 0x32a   : > { %v498_v32 = vmul.f32 %v636_v28, %v497_v30 }
 0x32c   : > { %v499_v34 = vadd.f32 %v636_v28, %v498_v32 }
 0x32e   : > { %v503_v36 = vsel %vm502_vm15, %v636_v28, %v499_v34 }
 0x32f   : > { %v508_v37 = vsel %vm505_vm0, %v507_v35, %v503_v36 }
 0x330   : > { %511 = vst.msk [vmem:[%s306_s22] sm:$0x3f] %vm510_vm14, %v508_v37 }
 0x331 PF: > { %s19_s28 = sadd.s32 1, %s659_s28   ;;  %s785_s26 = smov %s655_s27 }
 0x332   : > { %p16_p5 = scmp.ge.s32.totalorder %s19_s28, 4   ;;  %s786_s27 = smov %s788_s2 }
 0x334   :  { %18 = sbr.rel (!%p16_p5) target bundleno = 3 (0x3), region = 86 }

</bundles_post_ra>
